<compile_context>
chip_gen: v5e
topology: v5e:2x2
jax: 0.10.0
libtpu: 0.0.40
codegen_flags: <defaults>
</compile_context>

<pallas_src>
import jax
import jax.numpy as jnp
from jax.experimental import pallas as pl
from jax.experimental.pallas import tpu as pltpu

OUT_PAD = 128  # lane-dense logit slab width (full unmasked vst's)


def sleepnet_kernel(x_ref, w1_ref, b1_ref, w2_ref, b2_ref, w3_ref, b3_ref, o_ref):
    x = x_ref[...]                                   # (TB, in_dim) tile

    # fc1 + ReLU (tiny K -> MXU underutilized, but compute is never the
    # bottleneck at these widths; mem/overhead-bound kernel).
    h1 = jnp.dot(x, w1_ref[...], preferred_element_type=jnp.float32) + b1_ref[...]
    h1 = jnp.maximum(h1, 0.0)

    # dropout(p=0.2): identity in eval / inference mode (matches module.eval()).
    # TODO(synk): training-mode stochastic dropout (pltpu.prng_random_bits) not emitted.

    # fc2 + ReLU
    h2 = jnp.dot(h1, w2_ref[...], preferred_element_type=jnp.float32) + b2_ref[...]
    h2 = jnp.maximum(h2, 0.0)

    # fc3 -> lane-dense (TB, 128) slab; unused lanes carry zero-padded columns.
    out = jnp.dot(h2, w3_ref[...], preferred_element_type=jnp.float32) + b3_ref[...]
    o_ref[...] = out.astype(o_ref.dtype)


def _round_up(a, m):
    return (a + m - 1) // m * m


def prepare_params(params, out_pad=OUT_PAD):
    """One-time per-model prep: zero-pad fc3 to a 128-lane output slab."""
    w1, b1, w2, b2, w3, b3 = params
    out_dim = w3.shape[1]
    w3p = jnp.zeros((w3.shape[0], out_pad), w3.dtype).at[:, :out_dim].set(w3)
    b3p = jnp.zeros((1, out_pad), b3.dtype).at[:, :out_dim].set(b3)
    return (w1, b1, w2, b2, w3p, b3p), out_dim


def sleepnet_forward(x, prepped_params, out_dim, *, block_b=8192,
                     out_dtype=jnp.float32, return_padded=False):
    """x: (B, input_dim) f32. Returns (B, out_dim) logits
    (or the padded (B, 128) slab if return_padded=True; lanes >= out_dim are
    zero-weight logits and must be masked by the consumer)."""
    w1, b1, w2, b2, w3p, b3p = prepped_params
    B, in_dim = x.shape

    # Batch tile: multiple of 8 sublanes, large to amortize per-step overhead,
    # and capped at ceil(B/2) so v7x's 2 TensorCores both get grid steps.
    tb = max(8, min(_round_up(block_b, 8), _round_up(pl.cdiv(B, 2), 8)))
    grid = (pl.cdiv(B, tb),)   # ragged final block handled by Pallas; no jnp.pad copy

    out = pl.pallas_call(
        sleepnet_kernel,
        out_shape=jax.ShapeDtypeStruct((B, OUT_PAD), out_dtype),
        grid=grid,
        in_specs=[
            pl.BlockSpec((tb, in_dim), lambda i: (i, 0)),   # streamed activation tile
            pl.BlockSpec(w1.shape, lambda i: (0, 0)),       # VMEM-resident weights
            pl.BlockSpec(b1.shape, lambda i: (0, 0)),       # resident biases (no re-DMA)
            pl.BlockSpec(w2.shape, lambda i: (0, 0)),
            pl.BlockSpec(b2.shape, lambda i: (0, 0)),
            pl.BlockSpec(w3p.shape, lambda i: (0, 0)),
            pl.BlockSpec(b3p.shape, lambda i: (0, 0)),
        ],
        out_specs=pl.BlockSpec((tb, OUT_PAD), lambda i: (i, 0)),
        compiler_params=pltpu.CompilerParams(
            dimension_semantics=("parallel",)),             # megacore on v7x
    )(x, w1, b1, w2, b2, w3p, b3p)

    if return_padded:
        return out                    # avoids the extra HBM re-read of the slab
    return out[:, :out_dim]


def init_params(key, input_dim, output_dim):
    # Shapes mirror nn.Linear(input_dim,32), (32,16), (16,output_dim)
    # but stored as (in, out) so the kernel does x @ W.
    k1, k2, k3, k4, k5, k6 = jax.random.split(key, 6)
    w1 = jax.random.normal(k1, (input_dim, 32), jnp.float32) * 0.1
    b1 = jax.random.normal(k2, (1, 32), jnp.float32) * 0.01
    w2 = jax.random.normal(k3, (32, 16), jnp.float32) * 0.1
    b2 = jax.random.normal(k4, (1, 16), jnp.float32) * 0.01
    w3 = jax.random.normal(k5, (16, output_dim), jnp.float32) * 0.1
    b3 = jax.random.normal(k6, (1, output_dim), jnp.float32) * 0.01
    return (w1, b1, w2, b2, w3, b3)


def reference_forward(x, params):
    w1, b1, w2, b2, w3, b3 = params
    h1 = jnp.maximum(x @ w1 + b1, 0.0)
    h2 = jnp.maximum(h1 @ w2 + b2, 0.0)
    return h2 @ w3 + b3


if __name__ == "__main__":
    key = jax.random.PRNGKey(0)
    kx, kp, kx2 = jax.random.split(key, 3)

    input_dim = 4     # ['BMI Category', 'Stress Level', 'Occupation', 'Blood Pressure']
    output_dim = 3    # len(np.unique(y)) for Sleep Disorder classes
    params = init_params(kp, input_dim, output_dim)
    prepped, out_dim = prepare_params(params)        # one-time weight padding

    # Small-shape check (single grid step, B too small for 2 tiles).
    batch = 8
    x = jax.random.normal(kx, (batch, input_dim), jnp.float32)
    out = jax.block_until_ready(sleepnet_forward(x, prepped, out_dim))
    ref = reference_forward(x, params)
    assert out.shape == (batch, output_dim)
    assert jnp.allclose(out, ref, atol=1e-5, rtol=1e-5)

    # Multi-tile check: ragged batch + small tile exercises the grid, resident
    # weights, and the Pallas-handled partial final block (no wrapper pad).
    batch2 = 200
    x2 = jax.random.normal(kx2, (batch2, input_dim), jnp.float32)
    out2 = jax.block_until_ready(sleepnet_forward(x2, prepped, out_dim, block_b=64))
    ref2 = reference_forward(x2, params)
    assert out2.shape == (batch2, output_dim)
    assert jnp.allclose(out2, ref2, atol=1e-5, rtol=1e-5)

    # Padded-slab path (no post-kernel slice copy); lanes >= out_dim are zeros-weight logits.
    out3 = jax.block_until_ready(
        sleepnet_forward(x2, prepped, out_dim, block_b=64, return_padded=True))
    assert out3.shape == (batch2, OUT_PAD)
    assert jnp.allclose(out3[:, :out_dim], ref2, atol=1e-5, rtol=1e-5)

    print("KERNEL_OK")
</pallas_src>

<mosaic_0001>
module attributes {stable_mosaic.version = 11 : i64} {
  func.func @sleepnet_kernel(%arg0: i32, %arg1: memref<8x4xf32, #tpu.memory_space<vmem>>, %arg2: memref<4x32xf32, #tpu.memory_space<vmem>>, %arg3: memref<1x32xf32, #tpu.memory_space<vmem>>, %arg4: memref<32x16xf32, #tpu.memory_space<vmem>>, %arg5: memref<1x16xf32, #tpu.memory_space<vmem>>, %arg6: memref<16x128xf32, #tpu.memory_space<vmem>>, %arg7: memref<1x128xf32, #tpu.memory_space<vmem>>, %arg8: memref<8x128xf32, #tpu.memory_space<vmem>>) attributes {dimension_semantics = [#tpu.dimension_semantics<parallel>], iteration_bounds = array<i64: 1>, scalar_prefetch = 0 : i64, scratch_operands = 0 : i64, tpu.core_type = #tpu.core_type<tc>, window_params = [{transform_indices = @transform_0, window_bounds = array<i64: 8, 4>}, {pipeline_mode = #tpu.pipeline_mode<synchronous>, transform_indices = @transform_1, window_bounds = array<i64: 4, 32>}, {pipeline_mode = #tpu.pipeline_mode<synchronous>, transform_indices = @transform_2, window_bounds = array<i64: 1, 32>}, {pipeline_mode = #tpu.pipeline_mode<synchronous>, transform_indices = @transform_3, window_bounds = array<i64: 32, 16>}, {pipeline_mode = #tpu.pipeline_mode<synchronous>, transform_indices = @transform_4, window_bounds = array<i64: 1, 16>}, {pipeline_mode = #tpu.pipeline_mode<synchronous>, transform_indices = @transform_5, window_bounds = array<i64: 16, 128>}, {pipeline_mode = #tpu.pipeline_mode<synchronous>, transform_indices = @transform_6, window_bounds = array<i64: 1, 128>}, {transform_indices = @transform_7, window_bounds = array<i64: 8, 128>}]} {
    %c0 = arith.constant 0 : index
    %c0_0 = arith.constant 0 : index
    %0 = vector.load %arg1[%c0, %c0_0] : memref<8x4xf32, #tpu.memory_space<vmem>>, vector<8x4xf32>
    %c0_1 = arith.constant 0 : index
    %c0_2 = arith.constant 0 : index
    %1 = vector.load %arg2[%c0_1, %c0_2] : memref<4x32xf32, #tpu.memory_space<vmem>>, vector<4x32xf32>
    %cst = arith.constant dense<0.000000e+00> : vector<8x32xf32>
    %2 = tpu.matmul %0, %1, %cst {dimension_numbers = #tpu.dot_dimension_numbers<[1], [0], [0], [1], [0, 0, 1, 1], [], []>} : vector<8x4xf32>, vector<4x32xf32>, vector<8x32xf32> -> vector<8x32xf32>
    %c0_3 = arith.constant 0 : index
    %c0_4 = arith.constant 0 : index
    %3 = vector.load %arg3[%c0_3, %c0_4] : memref<1x32xf32, #tpu.memory_space<vmem>>, vector<1x32xf32>
    %4 = vector.broadcast %3 : vector<1x32xf32> to vector<8x32xf32>
    %5 = arith.addf %2, %4 : vector<8x32xf32>
    %cst_5 = arith.constant 0.000000e+00 : f32
    %6 = vector.broadcast %cst_5 : f32 to vector<8x32xf32>
    %7 = arith.maximumf %5, %6 : vector<8x32xf32>
    %c0_6 = arith.constant 0 : index
    %c0_7 = arith.constant 0 : index
    %8 = vector.load %arg4[%c0_6, %c0_7] : memref<32x16xf32, #tpu.memory_space<vmem>>, vector<32x16xf32>
    %cst_8 = arith.constant dense<0.000000e+00> : vector<8x16xf32>
    %9 = tpu.matmul %7, %8, %cst_8 {dimension_numbers = #tpu.dot_dimension_numbers<[1], [0], [0], [1], [0, 0, 1, 1], [], []>} : vector<8x32xf32>, vector<32x16xf32>, vector<8x16xf32> -> vector<8x16xf32>
    %c0_9 = arith.constant 0 : index
    %c0_10 = arith.constant 0 : index
    %10 = vector.load %arg5[%c0_9, %c0_10] : memref<1x16xf32, #tpu.memory_space<vmem>>, vector<1x16xf32>
    %11 = vector.broadcast %10 : vector<1x16xf32> to vector<8x16xf32>
    %12 = arith.addf %9, %11 : vector<8x16xf32>
    %cst_11 = arith.constant 0.000000e+00 : f32
    %13 = vector.broadcast %cst_11 : f32 to vector<8x16xf32>
    %14 = arith.maximumf %12, %13 : vector<8x16xf32>
    %c0_12 = arith.constant 0 : index
    %c0_13 = arith.constant 0 : index
    %15 = vector.load %arg6[%c0_12, %c0_13] : memref<16x128xf32, #tpu.memory_space<vmem>>, vector<16x128xf32>
    %cst_14 = arith.constant dense<0.000000e+00> : vector<8x128xf32>
    %16 = tpu.matmul %14, %15, %cst_14 {dimension_numbers = #tpu.dot_dimension_numbers<[1], [0], [0], [1], [0, 0, 1, 1], [], []>} : vector<8x16xf32>, vector<16x128xf32>, vector<8x128xf32> -> vector<8x128xf32>
    %c0_15 = arith.constant 0 : index
    %c0_16 = arith.constant 0 : index
    %17 = vector.load %arg7[%c0_15, %c0_16] : memref<1x128xf32, #tpu.memory_space<vmem>>, vector<1x128xf32>
    %18 = vector.broadcast %17 : vector<1x128xf32> to vector<8x128xf32>
    %19 = arith.addf %16, %18 : vector<8x128xf32>
    %c0_17 = arith.constant 0 : index
    %c0_18 = arith.constant 0 : index
    %20 = vector.load %arg8[%c0_17, %c0_18] : memref<8x128xf32, #tpu.memory_space<vmem>>, vector<8x128xf32>
    tpu.vector_store %arg8[%c0_17, %c0_18], %19 {strides = array<i32>} : memref<8x128xf32, #tpu.memory_space<vmem>>, vector<8x128xf32>,
    return
  }
  func.func @transform_0(%arg0: i32) -> (i32, i32) {
    %c0_i32 = arith.constant 0 : i32
    %c0_i32_0 = arith.constant 0 : i32
    return %arg0, %c0_i32 : i32, i32
  }
  func.func @transform_1(%arg0: i32) -> (i32, i32) {
    %c0_i32 = arith.constant 0 : i32
    %c0_i32_0 = arith.constant 0 : i32
    %c0_i32_1 = arith.constant 0 : i32
    return %c0_i32, %c0_i32_0 : i32, i32
  }
  func.func @transform_2(%arg0: i32) -> (i32, i32) {
    %c0_i32 = arith.constant 0 : i32
    %c0_i32_0 = arith.constant 0 : i32
    %c0_i32_1 = arith.constant 0 : i32
    return %c0_i32, %c0_i32_0 : i32, i32
  }
  func.func @transform_3(%arg0: i32) -> (i32, i32) {
    %c0_i32 = arith.constant 0 : i32
    %c0_i32_0 = arith.constant 0 : i32
    %c0_i32_1 = arith.constant 0 : i32
    return %c0_i32, %c0_i32_0 : i32, i32
  }
  func.func @transform_4(%arg0: i32) -> (i32, i32) {
    %c0_i32 = arith.constant 0 : i32
    %c0_i32_0 = arith.constant 0 : i32
    %c0_i32_1 = arith.constant 0 : i32
    return %c0_i32, %c0_i32_0 : i32, i32
  }
  func.func @transform_5(%arg0: i32) -> (i32, i32) {
    %c0_i32 = arith.constant 0 : i32
    %c0_i32_0 = arith.constant 0 : i32
    %c0_i32_1 = arith.constant 0 : i32
    return %c0_i32, %c0_i32_0 : i32, i32
  }
  func.func @transform_6(%arg0: i32) -> (i32, i32) {
    %c0_i32 = arith.constant 0 : i32
    %c0_i32_0 = arith.constant 0 : i32
    %c0_i32_1 = arith.constant 0 : i32
    return %c0_i32, %c0_i32_0 : i32, i32
  }
  func.func @transform_7(%arg0: i32) -> (i32, i32) {
    %c0_i32 = arith.constant 0 : i32
    %c0_i32_0 = arith.constant 0 : i32
    return %arg0, %c0_i32 : i32, i32
  }
}

</mosaic_0001>

<bundles_post_ra>
// kernel: tpu_custom_call.1
= control target key start
LH: loop header
LB: loop body
LE: loop exit
PB: predicated region body
PF: predicated region fallthrough
CT: control target
= control target key end

     0   :  { %vm37_vm0 = vcmask 1043456   ;;  %vm33_vm1 = vcmask 31744   ;;  %s253_s0 = inlined_call_operand.vmem [shape: f32[8,4], index: 0, kind: input, shape index: {}]   ;;  %s254_s1 = inlined_call_operand.vmem [shape: f32[4,32], index: 1, kind: input, shape index: {}]   ;;  %s255_s2 = inlined_call_operand.vmem [shape: f32[1,32], index: 2, kind: input, shape index: {}]   ;;  %s256_s3 = inlined_call_operand.vmem [shape: f32[32,16], index: 3, kind: input, shape index: {}]   ;;  %s257_s4 = inlined_call_operand.vmem [shape: f32[1,16], index: 4, kind: input, shape index: {}]   ;;  %s258_s5 = inlined_call_operand.vmem [shape: f32[16,128], index: 5, kind: input, shape index: {}]   ;;  %s259_s6 = inlined_call_operand.vmem [shape: f32[1,128], index: 6, kind: input, shape index: {}]   ;;  %s260_s7 = inlined_call_operand.hbm [shape: f32[8,128], index: 7, kind: output, shape index: {}]  }
   0x1   :  { %v28_v0 = vld [vmem:[%s254_s1] sm:$0xf]  ;;  %v65_v2 = vld [vmem:[%s256_s3 + $0x18] sm:$0xff] }
   0x2   :  { %v27_v1 = vld [vmem:[%s253_s0] sm:$0xff]  ;;  %142 = vmatpush.msk.msra.mxu0 %vm37_vm0, %v28_v0  ;;  %86 = vmatpush.msra.mxu1 %v65_v2 }
   0x3   :  { %143 = vmatmul.msk.f32.vlgmr.msra.gmra.mxu0 %vm33_vm1, %v27_v1 }
   0x4   :  { %12 = vsyncpa [#allocation3], 0  ;;  %v64_v3 = vld [vmem:[%s256_s3 + $0x10] sm:$0xff]  ;;  %v63_v4 = vld [vmem:[%s256_s3 + $0x8] sm:$0xff]  ;;  %vm70_vm2 = vcmask 261120   ;;  %vm101_vm3 = vcmask 130048  }
   0x5   :  { %87 = vmatpush.msra.mxu1 %v64_v3  ;;  %v62_v5 = vld [vmem:[%s256_s3] sm:$0xff]  ;;  %v96_v10 = vld [vmem:[%s258_s5 + $0x8] sm:$0xff]  ;;  %s176_s19 = smov [#allocation2]  }
   0x6   :  { %v147_v6 = vld [vmem:[%s255_s2] ss:$0 sm:$0xff]  ;;  %119 = vmatpush.msra.mxu2 %v96_v10  ;;  %s131_s20 = sshll.u32 %s176_s19, 4  ;;  %s132_s20 = int_to_ptr.vmem [resolvable:$true] %s131_s20 }
   0x7   :  { %88 = vmatpush.msra.mxu1 %v63_v4  ;;  %v95_v11 = vld [vmem:[%s258_s5] sm:$0xff]  ;;  %s133_s5 = sshll.u32 %s260_s7, 4  ;;  %s134_s5 = int_to_ptr.hbm [resolvable:$true] %s133_s5 }
   0x8   :  { %120 = vmatpush.msra.mxu2 %v95_v11  ;;  %v148_v12 = vld [vmem:[%s257_s4] ss:$0 sm:$0xff] }
   0x9   :  { %89 = vmatpush.msra.mxu1 %v62_v5  ;;  %v149_v16 = vld [vmem:[%s259_s6] ss:$0 sm:$0xff] }
  0x80   :  { %v58_v7 = vpop.f32.mrf.mxu0 }
  0x81   :  { %v59_v8 = vadd.f32 %v147_v6, %v58_v7 }
  0x83   :  { %v61_v9 = vmax.f32 %v59_v8, 0.0 }
  0x85   :  { %144 = vmatmul.msk.f32.vlgmr.msra.gmra.mxu1 %vm70_vm2, %v61_v9 }
 0x102   :  { %v91_v13 = vpop.f32.mrf.mxu1 }
 0x103   :  { %v92_v14 = vadd.f32 %v148_v12, %v91_v13 }
 0x105   :  { %v94_v15 = vmax.f32 %v92_v14, 0.0 }
 0x107   :  { %145 = vmatmul.msk.f32.vlgmr.msra.gmra.mxu2 %vm101_vm3, %v94_v15 }
 0x18a   :  { %v122_v17 = vpop.f32.mrf.mxu2 }
 0x18b   :  { %v123_v18 = vadd.f32 %v149_v16, %v122_v17 }
 0x18d   :  { %125 = vst [vmem:[#allocation2] sm:$0xff] %v123_v18 }
 0x18e   :  { %136 = dma.vmem_to_hbm [thread:$0]  %s132_s20, 128, %s134_s5, [#allocation3]  }
 0x18f   :  { %174 = dma.done.wait [#allocation3], 128  }
 0x190   :  { %175 = vsyncadd [#allocation3], 4294967168 }
 0x191   :  { %141 = vsyncpa [#allocation3], 1 }

</bundles_post_ra>
